<compile_context>
chip_gen: v7x
topology: tpu7x:2x2x1
jax: 0.10.0
libtpu: 0.0.40
codegen_flags: <defaults>
</compile_context>

<pallas_src>
import functools

import jax
import jax.numpy as jnp
from jax.experimental import pallas as pl
from jax.experimental.pallas import tpu as pltpu


VMEM_LIMIT = 32 * 1024 * 1024          # safe scoped-VMEM budget on v5e/v6e/v7x
BN_EPS = 1e-5
# (planes, num_blocks, stride) for layer1..layer4 of ResNet50
LAYERS = [(64, 3, 1), (128, 4, 2), (256, 6, 2), (512, 3, 2)]


# ----------------------------------------------------------------------------
# small helpers
# ----------------------------------------------------------------------------

def _round_up(v, m):
    return ((v + m - 1) // m) * m


def _pick_tm(m):
    for cand in (512, 448, 384, 320, 256, 192, 128):
        if m % cand == 0:
            return cand
    return min(512, _round_up(m, 16))


def _pick_tn(n):
    n128 = _round_up(n, 128)
    if n128 <= 256:
        return n128
    return 256 if n128 % 256 == 0 else 128


def _pick_tk(k):
    k128 = _round_up(k, 128)
    if k128 <= 512:
        return k128
    for cand in (512, 384, 256, 128):
        if k128 % cand == 0:
            return cand
    return 128


def _mosaic_params(dim_sem=None):
    kw = dict(vmem_limit_bytes=VMEM_LIMIT)
    if dim_sem is not None:
        kw["dimension_semantics"] = dim_sem
    return pltpu.CompilerParams(**kw)


# ----------------------------------------------------------------------------
# Kernel 1: tiled matmul with folded-BN affine + optional residual + ReLU
# ----------------------------------------------------------------------------

def _mm_bn_kernel(*refs, relu, has_res):
    if has_res:
        x_ref, w_ref, sc_ref, sh_ref, r_ref, o_ref, acc_ref = refs
    else:
        x_ref, w_ref, sc_ref, sh_ref, o_ref, acc_ref = refs
        r_ref = None
    k = pl.program_id(2)

    @pl.when(k == 0)
    def _():
        acc_ref[...] = jnp.zeros_like(acc_ref)

    acc_ref[...] += jnp.dot(x_ref[...], w_ref[...],
                            preferred_element_type=jnp.float32)

    @pl.when(k == pl.num_programs(2) - 1)
    def _():
        y = acc_ref[...] * sc_ref[...] + sh_ref[...]
        if has_res:
            y = y + r_ref[...].astype(jnp.float32)
        if relu:
            y = jnp.maximum(y, 0.0)
        o_ref[...] = y.astype(o_ref.dtype)


def matmul_bn_act(x, w, scale, shift, residual=None, relu=True,
                  out_dtype=jnp.bfloat16):
    """act((x @ w) * scale + shift [+ residual]); bf16 MXU, f32 accumulation."""
    m, k = x.shape
    _, n = w.shape
    tm, tn, tk = _pick_tm(m), _pick_tn(n), _pick_tk(k)
    mp, np_, kp = _round_up(m, tm), _round_up(n, tn), _round_up(k, tk)

    xb = x.astype(jnp.bfloat16)
    wb = w.astype(jnp.bfloat16)
    if (mp, kp) != (m, k):
        xb = jnp.pad(xb, ((0, mp - m), (0, kp - k)))
    if (kp, np_) != (k, n):
        wb = jnp.pad(wb, ((0, kp - k), (0, np_ - n)))
    sc = jnp.pad(scale.astype(jnp.float32), (0, np_ - n)).reshape(1, np_)
    sh = jnp.pad(shift.astype(jnp.float32), (0, np_ - n)).reshape(1, np_)

    inputs = [xb, wb, sc, sh]
    in_specs = [
        pl.BlockSpec((tm, tk), lambda i, j, kk: (i, kk)),
        pl.BlockSpec((tk, tn), lambda i, j, kk: (kk, j)),
        pl.BlockSpec((1, tn), lambda i, j, kk: (0, j)),
        pl.BlockSpec((1, tn), lambda i, j, kk: (0, j)),
    ]
    has_res = residual is not None
    if has_res:
        rb = residual.astype(jnp.bfloat16)
        if (mp, np_) != (m, n):
            rb = jnp.pad(rb, ((0, mp - m), (0, np_ - n)))
        inputs.append(rb)
        in_specs.append(pl.BlockSpec((tm, tn), lambda i, j, kk: (i, j)))

    out = pl.pallas_call(
        functools.partial(_mm_bn_kernel, relu=relu, has_res=has_res),
        out_shape=jax.ShapeDtypeStruct((mp, np_), out_dtype),
        grid_spec=pltpu.PrefetchScalarGridSpec(
            num_scalar_prefetch=0,
            grid=(mp // tm, np_ // tn, kp // tk),
            in_specs=in_specs,
            out_specs=pl.BlockSpec((tm, tn), lambda i, j, kk: (i, j)),
            scratch_shapes=[pltpu.VMEM((tm, tn), jnp.float32)]),
        compiler_params=_mosaic_params(("parallel", "parallel", "arbitrary")),
    )(*inputs)
    if (mp, np_) != (m, n):
        out = out[:m, :n]
    return out


# ----------------------------------------------------------------------------
# Kernel 2: direct 3x3 stride-1 conv (no HBM im2col) + folded BN + ReLU
# ----------------------------------------------------------------------------

def _conv3x3_kernel(x_ref, w_ref, sc_ref, sh_ref, o_ref, acc_ref, *, wp, m):
    # x_ref: (1, Hp*Wp, Cin) row-flattened padded image (VMEM-resident per grid
    # point).  Each of the 9 taps is a contiguous 2-D slice of this block, so
    # the 9x patch expansion never exists in HBM.
    acc_ref[...] = jnp.zeros_like(acc_ref)
    for di in range(3):
        for dj in range(3):
            lhs = x_ref[0, pl.ds(di * wp + dj, m), :]
            acc_ref[...] += jnp.dot(lhs, w_ref[di, dj],
                                    preferred_element_type=jnp.float32)
    y = jnp.maximum(acc_ref[...] * sc_ref[...] + sh_ref[...], 0.0)
    o_ref[0] = y.astype(o_ref.dtype)


def conv3x3_s1_bn_relu(x, w, scale, shift):
    """3x3 / stride 1 / pad 1 conv with folded BN + ReLU. x: (N,H,W,Cin)."""
    n, h, wdim, cin = x.shape
    cout = w.shape[3]
    oh, ow = h, wdim
    hp, wp = h + 3, wdim + 2                 # pad: top 1 / bottom 2, left 1 / right 1
    xp = jnp.pad(x, ((0, 0), (1, 2), (1, 1), (0, 0)))
    xf = xp.reshape(n, hp * wp, cin).astype(jnp.bfloat16)
    tcout = min(256, cout)                   # cout in {64,128,256,512} -> divides
    nct = cout // tcout
    m = oh * wp                              # includes (wp-ow) wrap columns, sliced below

    out = pl.pallas_call(
        functools.partial(_conv3x3_kernel, wp=wp, m=m),
        out_shape=jax.ShapeDtypeStruct((n, m, cout), jnp.bfloat16),
        grid_spec=pltpu.PrefetchScalarGridSpec(
            num_scalar_prefetch=0,
            grid=(n, nct),
            in_specs=[
                pl.BlockSpec((1, hp * wp, cin), lambda b, c: (b, 0, 0)),
                pl.BlockSpec((3, 3, cin, tcout), lambda b, c: (0, 0, 0, c)),
                pl.BlockSpec((1, tcout), lambda b, c: (0, c)),
                pl.BlockSpec((1, tcout), lambda b, c: (0, c)),
            ],
            out_specs=pl.BlockSpec((1, m, tcout), lambda b, c: (b, 0, c)),
            scratch_shapes=[pltpu.VMEM((m, tcout), jnp.float32)]),
        compiler_params=_mosaic_params(("parallel", "parallel")),
    )(xf, w.astype(jnp.bfloat16),
      scale.astype(jnp.float32).reshape(1, cout),
      shift.astype(jnp.float32).reshape(1, cout))
    # drop the wrap columns (garbage) and return NHWC
    return out.reshape(n, oh, wp, cout)[:, :, :ow, :]


# ----------------------------------------------------------------------------
# Kernel 3: maxpool (pairwise max over 9 tap views, row-tiled)
# ----------------------------------------------------------------------------

def _max_taps_kernel(*refs):
    o_ref = refs[-1]
    acc = refs[0][...]
    for r in refs[1:-1]:
        acc = jnp.maximum(acc, r[...])
    o_ref[...] = acc


def maxpool2d(x, k=3, stride=2, padding=1):
    n, h, w, c = x.shape
    xp = jnp.pad(x, ((0, 0), (padding, padding), (padding, padding), (0, 0)),
                 constant_values=-jnp.inf)
    oh = (h + 2 * padding - k) // stride + 1
    ow = (w + 2 * padding - k) // stride + 1
    m = n * oh * ow
    taps = [xp[:, i:i + stride * (oh - 1) + 1:stride,
               j:j + stride * (ow - 1) + 1:stride, :].reshape(m, c)
            for i in range(k) for j in range(k)]
    tm = min(512, _round_up(m, 16))
    mp = _round_up(m, tm)
    if mp != m:
        taps = [jnp.pad(t, ((0, mp - m), (0, 0)), constant_values=0.0)
                for t in taps]
    out = pl.pallas_call(
        _max_taps_kernel,
        out_shape=jax.ShapeDtypeStruct((mp, c), x.dtype),
        grid_spec=pltpu.PrefetchScalarGridSpec(
            num_scalar_prefetch=0, grid=(mp // tm,),
            in_specs=[pl.BlockSpec((tm, c), lambda i: (i, 0))] * (k * k),
            out_specs=pl.BlockSpec((tm, c), lambda i: (i, 0))),
        compiler_params=_mosaic_params(("parallel",)),
    )(*taps)
    return out[:m].reshape(n, oh, ow, c)


# ----------------------------------------------------------------------------
# Kernel 4: fused global-avgpool + FC + L2 normalize
# ----------------------------------------------------------------------------

def _head_kernel(x_ref, w_ref, b_ref, o_ref):
    feat = jnp.mean(x_ref[...].astype(jnp.float32), axis=1)      # (N, 2048)
    y = jnp.dot(feat.astype(jnp.bfloat16), w_ref[...],
                preferred_element_type=jnp.float32) + b_ref[...]
    norm = jnp.sqrt(jnp.sum(y * y, axis=1, keepdims=True))
    o_ref[...] = y / jnp.maximum(norm, 1e-12)    # torch F.normalize(p=2, eps=1e-12)


def head_pool_fc_normalize(x, fc_w, fc_b):
    n, h, w, c = x.shape
    d = fc_w.shape[1]
    return pl.pallas_call(
        _head_kernel,
        out_shape=jax.ShapeDtypeStruct((n, d), jnp.float32),
        in_specs=[pl.BlockSpec(memory_space=pltpu.MemorySpace.VMEM)] * 3,
        out_specs=pl.BlockSpec(memory_space=pltpu.MemorySpace.VMEM),
        compiler_params=_mosaic_params(),
    )(x.reshape(n, h * w, c).astype(jnp.bfloat16),
      fc_w.astype(jnp.bfloat16),
      fc_b.astype(jnp.float32).reshape(1, d))


# ----------------------------------------------------------------------------
# Conv wrappers (glue only; compute happens in the Pallas kernels above)
# ----------------------------------------------------------------------------

def conv1x1_bn(x, w, scale, shift, stride=1, relu=True, residual=None):
    """1x1 conv as a direct tiled matmul (no pad/concat); optional fused residual."""
    n, h, wdim, cin = x.shape
    cout = w.shape[3]
    if stride != 1:
        x = x[:, ::stride, ::stride, :]
        h, wdim = x.shape[1], x.shape[2]
    x2 = x.reshape(n * h * wdim, cin)
    r2 = residual.reshape(n * h * wdim, cout) if residual is not None else None
    out = matmul_bn_act(x2, w.reshape(cin, cout), scale, shift,
                        residual=r2, relu=relu)
    return out.reshape(n, h, wdim, cout)


def conv_bn_im2col(x, w, scale, shift, stride, padding, relu):
    """General KxK conv via patch extraction + tiled matmul (stem + stride-2 3x3)."""
    n, h, wdim, cin = x.shape
    kh, kw, _, cout = w.shape
    xp = jnp.pad(x, ((0, 0), (padding, padding), (padding, padding), (0, 0)))
    oh = (h + 2 * padding - kh) // stride + 1
    ow = (wdim + 2 * padding - kw) // stride + 1
    cols = []
    for i in range(kh):
        for j in range(kw):
            cols.append(xp[:, i:i + stride * (oh - 1) + 1:stride,
                           j:j + stride * (ow - 1) + 1:stride, :])
    patches = jnp.concatenate(cols, axis=-1).reshape(n * oh * ow, kh * kw * cin)
    out = matmul_bn_act(patches, w.reshape(kh * kw * cin, cout), scale, shift,
                        relu=relu)
    return out.reshape(n, oh, ow, cout)


# ----------------------------------------------------------------------------
# ResNet50 parameter construction (synthetic, deterministic; folded BN)
# ----------------------------------------------------------------------------

def init_conv_bn(key, kh, kw, cin, cout):
    k1, k2, k3, k4, k5 = jax.random.split(key, 5)
    fan_in = kh * kw * cin
    w = (jax.random.normal(k1, (kh, kw, cin, cout), jnp.float32)
         * jnp.sqrt(2.0 / fan_in)).astype(jnp.bfloat16)
    gamma = 1.0 + 0.01 * jax.random.normal(k2, (cout,), jnp.float32)
    beta = 0.01 * jax.random.normal(k3, (cout,), jnp.float32)
    mean = 0.01 * jax.random.normal(k4, (cout,), jnp.float32)
    var = 1.0 + 0.01 * jax.random.uniform(k5, (cout,), jnp.float32)
    scale = gamma / jnp.sqrt(var + BN_EPS)
    shift = beta - mean * scale
    return {"w": w, "scale": scale, "shift": shift}


def init_bottleneck(key, inplanes, planes, stride):
    ks = jax.random.split(key, 4)
    p = {
        "conv1": init_conv_bn(ks[0], 1, 1, inplanes, planes),
        "conv2": init_conv_bn(ks[1], 3, 3, planes, planes),
        "conv3": init_conv_bn(ks[2], 1, 1, planes, planes * 4),
    }
    if stride != 1 or inplanes != planes * 4:
        p["downsample"] = init_conv_bn(ks[3], 1, 1, inplanes, planes * 4)
    return p


def init_params(key, embedding_dim=512):
    keys = jax.random.split(key, 7)
    params = {"conv1": init_conv_bn(keys[0], 7, 7, 3, 64)}
    inplanes = 64
    layers = []
    for li, (planes, n_blocks, stride) in enumerate(LAYERS):
        lkeys = jax.random.split(keys[1 + li], n_blocks)
        layer = []
        for b in range(n_blocks):
            s = stride if b == 0 else 1
            layer.append(init_bottleneck(lkeys[b], inplanes, planes, s))
            inplanes = planes * 4
        layers.append(layer)
    params["layers"] = layers
    params["fc_w"] = (jax.random.normal(keys[5], (2048, embedding_dim), jnp.float32)
                      * (1.0 / jnp.sqrt(2048.0))).astype(jnp.bfloat16)
    params["fc_b"] = 0.01 * jax.random.normal(keys[6], (embedding_dim,), jnp.float32)
    return params


# ----------------------------------------------------------------------------
# Forward pass
# ----------------------------------------------------------------------------

def bottleneck_forward(x, p, stride):
    out = conv1x1_bn(x, p["conv1"]["w"], p["conv1"]["scale"],
                     p["conv1"]["shift"], relu=True)
    if stride == 1:
        out = conv3x3_s1_bn_relu(out, p["conv2"]["w"], p["conv2"]["scale"],
                                 p["conv2"]["shift"])
    else:
        out = conv_bn_im2col(out, p["conv2"]["w"], p["conv2"]["scale"],
                             p["conv2"]["shift"], stride=stride, padding=1,
                             relu=True)
    if "downsample" in p:
        identity = conv1x1_bn(x, p["downsample"]["w"], p["downsample"]["scale"],
                              p["downsample"]["shift"], stride=stride, relu=False)
    else:
        identity = x
    # conv3 (1x1) with residual-add + ReLU fused into the matmul epilogue
    return conv1x1_bn(out, p["conv3"]["w"], p["conv3"]["scale"],
                      p["conv3"]["shift"], relu=True, residual=identity)


def feature_extractor_forward(params, x_nchw):
    """x_nchw: (N, 3, H, W) float32 -> (N, embedding_dim) L2-normalized (f32)."""
    x = jnp.transpose(x_nchw.astype(jnp.float32), (0, 2, 3, 1)).astype(jnp.bfloat16)
    p = params["conv1"]
    x = conv_bn_im2col(x, p["w"], p["scale"], p["shift"], stride=2, padding=3,
                       relu=True)
    x = maxpool2d(x, k=3, stride=2, padding=1)
    for li, (planes, n_blocks, stride) in enumerate(LAYERS):
        for b in range(n_blocks):
            s = stride if b == 0 else 1
            x = bottleneck_forward(x, params["layers"][li][b], s)
    return head_pool_fc_normalize(x, params["fc_w"], params["fc_b"])


# ----------------------------------------------------------------------------
if __name__ == "__main__":
    key = jax.random.PRNGKey(0)
    kx, kp = jax.random.split(key)

    # Small but architecture-consistent input (PyTorch layout NCHW, 3 channels).
    batch, channels, spatial = 2, 3, 32
    x = jax.random.normal(kx, (batch, channels, spatial, spatial), jnp.float32)

    params = init_params(kp, embedding_dim=512)

    out = feature_extractor_forward(params, x)
    out = jax.block_until_ready(out)

    assert out.shape == (batch, 512), out.shape
    assert out.dtype == jnp.float32
    norms = jnp.linalg.norm(out, axis=1)
    assert bool(jnp.all(jnp.isfinite(out)))
    assert bool(jnp.all(jnp.abs(norms - 1.0) < 1e-3)), norms

    print("KERNEL_OK")
</pallas_src>

<mosaic_0001>
module attributes {stable_mosaic.version = 11 : i64} {
  func.func @_mm_bn_kernel(%arg0: i32, %arg1: i32, %arg2: i32, %arg3: memref<512x256xbf16, #tpu.memory_space<vmem>>, %arg4: memref<256x128xbf16, #tpu.memory_space<vmem>>, %arg5: memref<1x128xf32, #tpu.memory_space<vmem>>, %arg6: memref<1x128xf32, #tpu.memory_space<vmem>>, %arg7: memref<512x128xbf16, #tpu.memory_space<vmem>>, %arg8: memref<512x128xf32, #tpu.memory_space<vmem>>) attributes {dimension_semantics = [#tpu.dimension_semantics<parallel>, #tpu.dimension_semantics<parallel>, #tpu.dimension_semantics<arbitrary>], iteration_bounds = array<i64: 1, 1, 1>, scalar_prefetch = 0 : i64, scratch_operands = 1 : i64, tpu.core_type = #tpu.core_type<tc>, window_params = [{transform_indices = @transform_0, window_bounds = array<i64: 512, 256>}, {transform_indices = @transform_1, window_bounds = array<i64: 256, 128>}, {transform_indices = @transform_2, window_bounds = array<i64: 1, 128>}, {transform_indices = @transform_3, window_bounds = array<i64: 1, 128>}, {transform_indices = @transform_4, window_bounds = array<i64: 512, 128>}]} {
    %c0_i32 = arith.constant 0 : i32
    %0 = arith.cmpi eq, %arg2, %c0_i32 : i32
    %1 = arith.extui %0 : i1 to i32
    %c0_i32_0 = arith.constant 0 : i32
    %2 = arith.cmpi ne, %1, %c0_i32_0 : i32
    scf.if %2 {
      %cst_10 = arith.constant 0.000000e+00 : f32
      %12 = vector.broadcast %cst_10 : f32 to vector<512x128xf32>
      %c0_11 = arith.constant 0 : index
      %c0_12 = arith.constant 0 : index
      %13 = vector.load %arg8[%c0_11, %c0_12] : memref<512x128xf32, #tpu.memory_space<vmem>>, vector<512x128xf32>
      tpu.vector_store %arg8[%c0_11, %c0_12], %12 {strides = array<i32>} : memref<512x128xf32, #tpu.memory_space<vmem>>, vector<512x128xf32>,
    } else {
    }
    %c0 = arith.constant 0 : index
    %c0_1 = arith.constant 0 : index
    %3 = vector.load %arg8[%c0, %c0_1] : memref<512x128xf32, #tpu.memory_space<vmem>>, vector<512x128xf32>
    %c0_2 = arith.constant 0 : index
    %c0_3 = arith.constant 0 : index
    %4 = vector.load %arg3[%c0_2, %c0_3] : memref<512x256xbf16, #tpu.memory_space<vmem>>, vector<512x256xbf16>
    %c0_4 = arith.constant 0 : index
    %c0_5 = arith.constant 0 : index
    %5 = vector.load %arg4[%c0_4, %c0_5] : memref<256x128xbf16, #tpu.memory_space<vmem>>, vector<256x128xbf16>
    %cst = arith.constant dense<0.000000e+00> : vector<512x128xf32>
    %6 = tpu.matmul %4, %5, %cst {dimension_numbers = #tpu.dot_dimension_numbers<[1], [0], [0], [1], [0, 0, 1, 1], [], []>} : vector<512x256xbf16>, vector<256x128xbf16>, vector<512x128xf32> -> vector<512x128xf32>
    %7 = arith.addf %3, %6 : vector<512x128xf32>
    %c0_6 = arith.constant 0 : index
    %c0_7 = arith.constant 0 : index
    %8 = vector.load %arg8[%c0_6, %c0_7] : memref<512x128xf32, #tpu.memory_space<vmem>>, vector<512x128xf32>
    tpu.vector_store %arg8[%c0_6, %c0_7], %7 {strides = array<i32>} : memref<512x128xf32, #tpu.memory_space<vmem>>, vector<512x128xf32>,
    %c0_i32_8 = arith.constant 0 : i32
    %9 = arith.cmpi eq, %arg2, %c0_i32_8 : i32
    %10 = arith.extui %9 : i1 to i32
    %c0_i32_9 = arith.constant 0 : i32
    %11 = arith.cmpi ne, %10, %c0_i32_9 : i32
    scf.if %11 {
      %c0_10 = arith.constant 0 : index
      %c0_11 = arith.constant 0 : index
      %12 = vector.load %arg8[%c0_10, %c0_11] : memref<512x128xf32, #tpu.memory_space<vmem>>, vector<512x128xf32>
      %c0_12 = arith.constant 0 : index
      %c0_13 = arith.constant 0 : index
      %13 = vector.load %arg5[%c0_12, %c0_13] : memref<1x128xf32, #tpu.memory_space<vmem>>, vector<1x128xf32>
      %14 = vector.broadcast %13 : vector<1x128xf32> to vector<512x128xf32>
      %15 = arith.mulf %12, %14 : vector<512x128xf32>
      %c0_14 = arith.constant 0 : index
      %c0_15 = arith.constant 0 : index
      %16 = vector.load %arg6[%c0_14, %c0_15] : memref<1x128xf32, #tpu.memory_space<vmem>>, vector<1x128xf32>
      %17 = vector.broadcast %16 : vector<1x128xf32> to vector<512x128xf32>
      %18 = arith.addf %15, %17 : vector<512x128xf32>
      %cst_16 = arith.constant 0.000000e+00 : f32
      %19 = vector.broadcast %cst_16 : f32 to vector<512x128xf32>
      %20 = arith.maximumf %18, %19 : vector<512x128xf32>
      %21 = arith.truncf %20 : vector<512x128xf32> to vector<512x128xbf16>
      %c0_17 = arith.constant 0 : index
      %c0_18 = arith.constant 0 : index
      %22 = vector.load %arg7[%c0_17, %c0_18] : memref<512x128xbf16, #tpu.memory_space<vmem>>, vector<512x128xbf16>
      tpu.vector_store %arg7[%c0_17, %c0_18], %21 {strides = array<i32>} : memref<512x128xbf16, #tpu.memory_space<vmem>>, vector<512x128xbf16>,
    } else {
    }
    return
  }
  func.func @transform_0(%arg0: i32, %arg1: i32, %arg2: i32) -> (i32, i32) {
    %c0_i32 = arith.constant 0 : i32
    return %arg0, %arg2 : i32, i32
  }
  func.func @transform_1(%arg0: i32, %arg1: i32, %arg2: i32) -> (i32, i32) {
    %c0_i32 = arith.constant 0 : i32
    return %arg2, %arg1 : i32, i32
  }
  func.func @transform_2(%arg0: i32, %arg1: i32, %arg2: i32) -> (i32, i32) {
    %c0_i32 = arith.constant 0 : i32
    %c0_i32_0 = arith.constant 0 : i32
    return %c0_i32, %arg1 : i32, i32
  }
  func.func @transform_3(%arg0: i32, %arg1: i32, %arg2: i32) -> (i32, i32) {
    %c0_i32 = arith.constant 0 : i32
    %c0_i32_0 = arith.constant 0 : i32
    return %c0_i32, %arg1 : i32, i32
  }
  func.func @transform_4(%arg0: i32, %arg1: i32, %arg2: i32) -> (i32, i32) {
    %c0_i32 = arith.constant 0 : i32
    return %arg0, %arg1 : i32, i32
  }
}

</mosaic_0001>

<bundles_post_ra>
// kernel: tpu_custom_call.1
= control target key start
LH: loop header
LB: loop body
LE: loop exit
PB: predicated region body
PF: predicated region fallthrough
CT: control target
= control target key end

     0   :  { %9 = vsyncpa [#allocation4], 0  ;;  %s2589_s0 = inlined_call_operand.hbm [shape: bf16[512,256], index: 0, kind: input, shape index: {}]   ;;  %s2590_s1 = inlined_call_operand.hbm [shape: bf16[256,128], index: 1, kind: input, shape index: {}]   ;;  %s2591_s2 = inlined_call_operand.vmem [shape: f32[1,128], index: 2, kind: input, shape index: {}]   ;;  %s2592_s3 = inlined_call_operand.vmem [shape: f32[1,128], index: 3, kind: input, shape index: {}]   ;;  %s2593_s4 = inlined_call_operand.hbm [shape: bf16[512,128], index: 4, kind: output, shape index: {}]  }
   0x1   :  { %10 = vsyncpa [#allocation7], 0 }
   0x2   :  { %11 = vsyncpa [#allocation5], 0  ;;  %s2344_s15 = smov [#allocation3]   ;;  %s2272_s19 = scalar_lea.hbm %s2589_s0, 8192 }
   0x3   :  { %s17_s16 = sshll.u32 %s2344_s15, 4  ;;  %p2273_p0 = scmp.ne.s32.totalorder %s2589_s0, %s2272_s19  ;;  %s18_s16 = int_to_ptr.vmem [resolvable:$true] %s17_s16 }
   0x4   :  { %p2276_p1 = scmp.lt.u32.totalorder %s2272_s19, %s2589_s0 }
   0x6   :  { %p2278_p2 = pnand %p2276_p1, %p2273_p0 }
   0x8   :  { %2281 = shalt.err (!%p2278_p2)
}
   0x9   :  { %s2282_s24 = scalar_lea.vmem %s18_s16, 8192  ;;  %p2287_p4 = scmp.lt.s32.totalorder %s18_s16, %s18_s16 }
   0xa   :  { %p2283_p3 = scmp.ne.s32.totalorder %s18_s16, %s2282_s24  ;;  %p2288_p5 = scmp.lt.s32.totalorder %s2282_s24, %s2282_s24 }
   0xc   :  { %p2289_p6 = por %p2288_p5, %p2287_p4 }
   0xe   :  { %p2290_p7 = pnand %p2289_p6, %p2283_p3 }
  0x10   :  { %2293 = shalt.err (!%p2290_p7)
}
  0x11   :  { %s2345_s25 = smov 128   ;;  %s2346_s26 = smov 8  }
  0x12   :  { %23 = dma.hbm_to_vmem [thread:$0]  %s2589_s0, 8192, %s18_s16, [#allocation4], %s2345_s25, %s2345_s25, %s2346_s26  }
  0x13   :  { %s2347_s29 = smov [#allocation6]   ;;  %s2294_s7 = scalar_lea.hbm %s2590_s1, 2048 }
  0x14   :  { %s29_s30 = sshll.u32 %s2347_s29, 4  ;;  %p2295_p8 = scmp.ne.s32.totalorder %s2590_s1, %s2294_s7  ;;  %s30_s30 = int_to_ptr.vmem [resolvable:$true] %s29_s30 }
  0x15   :  { %p2298_p9 = scmp.lt.u32.totalorder %s2294_s7, %s2590_s1 }
  0x17   :  { %p2300_p10 = pnand %p2298_p9, %p2295_p8 }
  0x19   :  { %2303 = shalt.err (!%p2300_p10)
}
  0x1a   :  { %s2304_s12 = scalar_lea.vmem %s30_s30, 2048  ;;  %p2309_p12 = scmp.lt.s32.totalorder %s30_s30, %s30_s30 }
  0x1b   :  { %p2305_p11 = scmp.ne.s32.totalorder %s30_s30, %s2304_s12  ;;  %p2310_p13 = scmp.lt.s32.totalorder %s2304_s12, %s2304_s12 }
  0x1d   :  { %p2311_p0 = por %p2310_p13, %p2309_p12 }
  0x1f   :  { %p2312_p1 = pnand %p2311_p0, %p2305_p11 }
  0x21   :  { %2315 = shalt.err (!%p2312_p1)
}
  0x22   :  { %s2348_s0 = smov 64   ;;  %s2349_s13 = smov 4  }
  0x23   :  { %35 = dma.hbm_to_vmem [thread:$0]  %s2590_s1, 2048, %s30_s30, [#allocation7], %s2348_s0, %s2348_s0, %s2349_s13  }
  0x24   :  { %2338 = dma.done.wait [#allocation4], 8192  }
  0x25   :  { %2339 = vsyncadd [#allocation4], 4294959104 }
  0x26   :  { %2340 = dma.done.wait [#allocation7], 2048  }
  0x27   :  { %2341 = vsyncadd [#allocation7], 4294965248  ;;  %v2350_v0 = vmov 0   ;;  %v2160_v1 = vld [vmem:[#allocation6] sm:$0xff]   ;;  %v2161_v2 = vld [vmem:[#allocation6 + $0x8] sm:$0xff]  }
  0x28   :  { %691 = vmatprep.subr.bf16.mxu0 %v2350_v0  ;;  %2120 = vmatprep.subr.bf16.mxu1 %v2350_v0  ;;  %v2162_v3 = vld [vmem:[#allocation6 + $0x10] sm:$0xff]   ;;  %v2163_v4 = vld [vmem:[#allocation6 + $0x18] sm:$0xff]   ;;  %v2164_v5 = vld [vmem:[#allocation6 + $0x20] sm:$0xff]  }
  0x29   :  { %692 = vmatpush1.bf16.msra.mxu0 %v2160_v1  ;;  %2136 = vmatpush1.bf16.msra.mxu1 %v2160_v1  ;;  %v2178_v6 = vld [vmem:[#allocation3 + $0x4] ss:$8 sps:$4 sm:$0xff]   ;;  %v2166_v9 = vld [vmem:[#allocation6 + $0x30] sm:$0xff]   ;;  %v2167_v10 = vld [vmem:[#allocation6 + $0x38] sm:$0xff]  }
  0x2a   :  { %693 = vmatprep.subr.bf16.mxu0 %v2350_v0  ;;  %2121 = vmatprep.subr.bf16.mxu1 %v2350_v0  ;;  %v2165_v7 = vld [vmem:[#allocation6 + $0x28] sm:$0xff]   ;;  %v2168_v11 = vld [vmem:[#allocation6 + $0x40] sm:$0xff]   ;;  %v2170_v13 = vld [vmem:[#allocation6 + $0x50] sm:$0xff]  }
  0x2b   :  { %v2181_v8 = vld [vmem:[#allocation3 + $0x104] ss:$8 sps:$4 sm:$0xff]   ;;  %723 = vmatprep.mubr.bf16.mxu0 %v2178_v6  ;;  %v2171_v14 = vld [vmem:[#allocation6 + $0x58] sm:$0xff]   ;;  %v2174_v17 = vld [vmem:[#allocation6 + $0x70] sm:$0xff]  }
  0x2c   :  { %851 = vmatprep.mubr.bf16.mxu1 %v2181_v8  ;;  %v2169_v12 = vld [vmem:[#allocation6 + $0x48] sm:$0xff]   ;;  %v2172_v15 = vld [vmem:[#allocation6 + $0x60] sm:$0xff]   ;;  %v2175_v18 = vld [vmem:[#allocation6 + $0x78] sm:$0xff]  }
  0x2d   :  { %694 = vmatpush1.bf16.msra.mxu0 %v2161_v2  ;;  %2137 = vmatpush1.bf16.msra.mxu1 %v2161_v2  ;;  %v2173_v16 = vld [vmem:[#allocation6 + $0x68] sm:$0xff]   ;;  %v2182_v21 = vld [vmem:[#allocation3 + $0x14] ss:$8 sps:$4 sm:$0xff]   ;;  %v2186_v23 = vld [vmem:[#allocation3 + $0x10] ss:$8 sps:$4 sm:$0xff]  }
  0x2e   :  { %695 = vmatprep.subr.bf16.mxu0 %v2350_v0  ;;  %2122 = vmatprep.subr.bf16.mxu1 %v2350_v0  ;;  %v2176_v19 = vld [vmem:[#allocation3] ss:$8 sps:$4 sm:$0xff]   ;;  %v2184_v22 = vld [vmem:[#allocation3 + $0x114] ss:$8 sps:$4 sm:$0xff]   ;;  %v2187_v24 = vld [vmem:[#allocation3 + $0x110] ss:$8 sps:$4 sm:$0xff]  }
  0x2f   :  { %v2179_v20 = vld [vmem:[#allocation3 + $0x100] ss:$8 sps:$4 sm:$0xff]   ;;  %v2188_v25 = vld [vmem:[#allocation3 + $0x24] ss:$8 sps:$4 sm:$0xff]   ;;  %v2194_v29 = vld [vmem:[#allocation3 + $0x34] ss:$8 sps:$4 sm:$0xff]  }
  0x30   :  { %v2190_v26 = vld [vmem:[#allocation3 + $0x124] ss:$8 sps:$4 sm:$0xff]   ;;  %v2192_v27 = vld [vmem:[#allocation3 + $0x20] ss:$8 sps:$4 sm:$0xff]   ;;  %v2196_v30 = vld [vmem:[#allocation3 + $0x134] ss:$8 sps:$4 sm:$0xff]  }
  0x31   :  { %696 = vmatpush1.bf16.msra.mxu0 %v2162_v3  ;;  %2138 = vmatpush1.bf16.msra.mxu1 %v2162_v3  ;;  %v2193_v28 = vld [vmem:[#allocation3 + $0x120] ss:$8 sps:$4 sm:$0xff]   ;;  %v2198_v31 = vld [vmem:[#allocation3 + $0x30] ss:$8 sps:$4 sm:$0xff]   ;;  %v2200_v33 = vld [vmem:[#allocation3 + $0x44] ss:$8 sps:$4 sm:$0xff]  }
  0x32   :  { %697 = vmatprep.subr.bf16.mxu0 %v2350_v0  ;;  %2123 = vmatprep.subr.bf16.mxu1 %v2350_v0  ;;  %v2199_v32 = vld [vmem:[#allocation3 + $0x130] ss:$8 sps:$4 sm:$0xff]   ;;  %v2202_v34 = vld [vmem:[#allocation3 + $0x144] ss:$8 sps:$4 sm:$0xff]   ;;  %v2204_v35 = vld [vmem:[#allocation3 + $0x40] ss:$8 sps:$4 sm:$0xff]  }
  0x33   :  { %v2205_v36 = vld [vmem:[#allocation3 + $0x140] ss:$8 sps:$4 sm:$0xff]   ;;  %v2206_v37 = vld [vmem:[#allocation3 + $0x54] ss:$8 sps:$4 sm:$0xff]   ;;  %v2210_v39 = vld [vmem:[#allocation3 + $0x50] ss:$8 sps:$4 sm:$0xff]  }
  0x34   :  { %v2208_v38 = vld [vmem:[#allocation3 + $0x154] ss:$8 sps:$4 sm:$0xff]   ;;  %v2211_v40 = vld [vmem:[#allocation3 + $0x150] ss:$8 sps:$4 sm:$0xff]   ;;  %v2212_v41 = vld [vmem:[#allocation3 + $0x64] ss:$8 sps:$4 sm:$0xff]  }
  0x35   :  { %698 = vmatpush1.bf16.msra.mxu0 %v2163_v4  ;;  %2139 = vmatpush1.bf16.msra.mxu1 %v2163_v4  ;;  %v2214_v42 = vld [vmem:[#allocation3 + $0x164] ss:$8 sps:$4 sm:$0xff]   ;;  %v2216_v43 = vld [vmem:[#allocation3 + $0x60] ss:$8 sps:$4 sm:$0xff]   ;;  %v2218_v45 = vld [vmem:[#allocation3 + $0x74] ss:$8 sps:$4 sm:$0xff]  }
  0x36   :  { %699 = vmatprep.subr.bf16.mxu0 %v2350_v0  ;;  %2124 = vmatprep.subr.bf16.mxu1 %v2350_v0  ;;  %v2217_v44 = vld [vmem:[#allocation3 + $0x160] ss:$8 sps:$4 sm:$0xff]   ;;  %v2220_v46 = vld [vmem:[#allocation3 + $0x174] ss:$8 sps:$4 sm:$0xff]   ;;  %v2222_v47 = vld [vmem:[#allocation3 + $0x70] ss:$8 sps:$4 sm:$0xff]  }
  0x37   :  { %v2223_v48 = vld [vmem:[#allocation3 + $0x170] ss:$8 sps:$4 sm:$0xff]   ;;  %v2224_v49 = vld [vmem:[#allocation3 + $0x84] ss:$8 sps:$4 sm:$0xff]   ;;  %v2228_v51 = vld [vmem:[#allocation3 + $0x80] ss:$8 sps:$4 sm:$0xff]  }
  0x38   :  { %v2226_v50 = vld [vmem:[#allocation3 + $0x184] ss:$8 sps:$4 sm:$0xff]   ;;  %v2229_v52 = vld [vmem:[#allocation3 + $0x180] ss:$8 sps:$4 sm:$0xff]   ;;  %v2230_v53 = vld [vmem:[#allocation3 + $0x94] ss:$8 sps:$4 sm:$0xff]  }
  0x39   :  { %700 = vmatpush1.bf16.msra.mxu0 %v2164_v5  ;;  %2140 = vmatpush1.bf16.msra.mxu1 %v2164_v5  ;;  %v2232_v54 = vld [vmem:[#allocation3 + $0x194] ss:$8 sps:$4 sm:$0xff]   ;;  %v2234_v55 = vld [vmem:[#allocation3 + $0x90] ss:$8 sps:$4 sm:$0xff]   ;;  %v2236_v57 = vld [vmem:[#allocation3 + $0xa4] ss:$8 sps:$4 sm:$0xff]  }
  0x3a   :  { %701 = vmatprep.subr.bf16.mxu0 %v2350_v0  ;;  %2125 = vmatprep.subr.bf16.mxu1 %v2350_v0  ;;  %v2235_v56 = vld [vmem:[#allocation3 + $0x190] ss:$8 sps:$4 sm:$0xff]   ;;  %v2238_v58 = vld [vmem:[#allocation3 + $0x1a4] ss:$8 sps:$4 sm:$0xff]   ;;  %v2240_v59 = vld [vmem:[#allocation3 + $0xa0] ss:$8 sps:$4 sm:$0xff]  }
  0x3b   :  { %v2241_v60 = vld [vmem:[#allocation3 + $0x1a0] ss:$8 sps:$4 sm:$0xff]   ;;  %v2242_v61 = vld [vmem:[#allocation3 + $0xb4] ss:$8 sps:$4 sm:$0xff]   ;;  %v2246_v63 = vld [vmem:[#allocation3 + $0xb0] ss:$8 sps:$4 sm:$0xff]  }
  0x3c   :  { %v2244_v62 = vld [vmem:[#allocation3 + $0x1b4] ss:$8 sps:$4 sm:$0xff]   ;;  %v2248_v1 = vld [vmem:[#allocation3 + $0xc4] ss:$8 sps:$4 sm:$0xff]   ;;  %v2252_v3 = vld [vmem:[#allocation3 + $0xc0] ss:$8 sps:$4 sm:$0xff]  }
  0x3d   :  { %702 = vmatpush1.bf16.msra.mxu0 %v2165_v7  ;;  %2141 = vmatpush1.bf16.msra.mxu1 %v2165_v7  ;;  %v2250_v2 = vld [vmem:[#allocation3 + $0x1c4] ss:$8 sps:$4 sm:$0xff]   ;;  %v2253_v4 = vld [vmem:[#allocation3 + $0x1c0] ss:$8 sps:$4 sm:$0xff]   ;;  %v2254_v5 = vld [vmem:[#allocation3 + $0xd4] ss:$8 sps:$4 sm:$0xff]  }
  0x3e   :  { %703 = vmatprep.subr.bf16.mxu0 %v2350_v0  ;;  %2126 = vmatprep.subr.bf16.mxu1 %v2350_v0  ;;  %v2256_v6 = vld [vmem:[#allocation3 + $0x1d4] ss:$8 sps:$4 sm:$0xff]   ;;  %v2258_v7 = vld [vmem:[#allocation3 + $0xd0] ss:$8 sps:$4 sm:$0xff]  }
  0x3f   :  { %v2259_v8 = vld [vmem:[#allocation3 + $0x1d0] ss:$8 sps:$4 sm:$0xff]  }
  0x41   :  { %704 = vmatpush1.bf16.msra.mxu0 %v2166_v9  ;;  %2142 = vmatpush1.bf16.msra.mxu1 %v2166_v9  ;;  %v2260_v9 = vld [vmem:[#allocation3 + $0xe4] ss:$8 sps:$4 sm:$0xff]  }
  0x42   :  { %705 = vmatprep.subr.bf16.mxu0 %v2350_v0  ;;  %2127 = vmatprep.subr.bf16.mxu1 %v2350_v0 }
  0x45   :  { %706 = vmatpush1.bf16.msra.mxu0 %v2167_v10  ;;  %2143 = vmatpush1.bf16.msra.mxu1 %v2167_v10  ;;  %v2262_v10 = vld [vmem:[#allocation3 + $0x1e4] ss:$8 sps:$4 sm:$0xff]  }
  0x46   :  { %707 = vmatprep.subr.bf16.mxu0 %v2350_v0  ;;  %2128 = vmatprep.subr.bf16.mxu1 %v2350_v0 }
  0x49   :  { %708 = vmatpush1.bf16.msra.mxu0 %v2168_v11  ;;  %2144 = vmatpush1.bf16.msra.mxu1 %v2168_v11  ;;  %v2264_v11 = vld [vmem:[#allocation3 + $0xe0] ss:$8 sps:$4 sm:$0xff]  }
  0x4a   :  { %709 = vmatprep.subr.bf16.mxu0 %v2350_v0  ;;  %2129 = vmatprep.subr.bf16.mxu1 %v2350_v0 }
  0x4d   :  { %710 = vmatpush1.bf16.msra.mxu0 %v2169_v12  ;;  %2145 = vmatpush1.bf16.msra.mxu1 %v2169_v12  ;;  %v2265_v12 = vld [vmem:[#allocation3 + $0x1e0] ss:$8 sps:$4 sm:$0xff]  }
  0x4e   :  { %711 = vmatprep.subr.bf16.mxu0 %v2350_v0  ;;  %2130 = vmatprep.subr.bf16.mxu1 %v2350_v0 }
  0x51   :  { %712 = vmatpush1.bf16.msra.mxu0 %v2170_v13  ;;  %2146 = vmatpush1.bf16.msra.mxu1 %v2170_v13  ;;  %v2266_v13 = vld [vmem:[#allocation3 + $0xf4] ss:$8 sps:$4 sm:$0xff]  }
  0x52   :  { %713 = vmatprep.subr.bf16.mxu0 %v2350_v0  ;;  %2131 = vmatprep.subr.bf16.mxu1 %v2350_v0 }
  0x55   :  { %714 = vmatpush1.bf16.msra.mxu0 %v2171_v14  ;;  %2147 = vmatpush1.bf16.msra.mxu1 %v2171_v14  ;;  %v2268_v14 = vld [vmem:[#allocation3 + $0x1f4] ss:$8 sps:$4 sm:$0xff]  }
  0x56   :  { %715 = vmatprep.subr.bf16.mxu0 %v2350_v0  ;;  %2132 = vmatprep.subr.bf16.mxu1 %v2350_v0 }
  0x59   :  { %716 = vmatpush1.bf16.msra.mxu0 %v2172_v15  ;;  %2148 = vmatpush1.bf16.msra.mxu1 %v2172_v15  ;;  %v2270_v15 = vld [vmem:[#allocation3 + $0xf0] ss:$8 sps:$4 sm:$0xff]  }
  0x5a   :  { %717 = vmatprep.subr.bf16.mxu0 %v2350_v0  ;;  %2133 = vmatprep.subr.bf16.mxu1 %v2350_v0 }
  0x5d   :  { %718 = vmatpush1.bf16.msra.mxu0 %v2173_v16  ;;  %2149 = vmatpush1.bf16.msra.mxu1 %v2173_v16  ;;  %v2271_v16 = vld [vmem:[#allocation3 + $0x1f0] ss:$8 sps:$4 sm:$0xff]  }
  0x5e   :  { %719 = vmatprep.subr.bf16.mxu0 %v2350_v0  ;;  %2134 = vmatprep.subr.bf16.mxu1 %v2350_v0 }
  0x61   :  { %720 = vmatpush1.bf16.msra.mxu0 %v2174_v17  ;;  %2150 = vmatpush1.bf16.msra.mxu1 %v2174_v17  ;;  %v2439_v17 = vld [vmem:[%s2591_s2] ss:$0 sm:$0xff]  ;;  %s2351_s2 = smov [#allocation8]  }
  0x62   :  { %721 = vmatprep.subr.bf16.mxu0 %v2350_v0  ;;  %2135 = vmatprep.subr.bf16.mxu1 %v2350_v0  ;;  %v2247_v0 = vld [vmem:[#allocation3 + $0x1b0] ss:$8 sps:$4 sm:$0xff]  }
  0x65   :  { %722 = vmatpush1.bf16.msra.mxu0 %v2175_v18  ;;  %2151 = vmatpush1.bf16.msra.mxu1 %v2175_v18 }
  0x68   :  { %724 = vmatmul.mubr.bf16.vlgmr.msra.gmra.mrb[0].mxu0 %v2176_v19  ;;  %852 = vmatmul.mubr.bf16.vlgmr.msra.gmra.mrb[0].mxu1 %v2179_v20  ;;  %v2444_v19 = vld [vmem:[%s2592_s3] ss:$0 sm:$0xff]  ;;  %s1706_s3 = sshll.u32 %s2351_s2, 4  ;;  %s1707_s3 = int_to_ptr.vmem [resolvable:$true] %s1706_s3 }
  0x69   :  { %731 = vmatprep.mubr.bf16.mxu0 %v2182_v21  ;;  %859 = vmatprep.mubr.bf16.mxu1 %v2184_v22  ;;  %s2316_s19 = scalar_lea.vmem %s1707_s3, 4096  ;;  %p2321_p3 = scmp.lt.s32.totalorder %s1707_s3, %s1707_s3 }
  0x6a   :  { %p2317_p2 = scmp.ne.s32.totalorder %s1707_s3, %s2316_s19  ;;  %p2322_p4 = scmp.lt.s32.totalorder %s2316_s19, %s2316_s19 }
  0x6c   :  { %p2323_p5 = por %p2322_p4, %p2321_p3 }
  0x6e   :  { %p2324_p6 = pnand %p2323_p5, %p2317_p2 }
  0x70   :  { %732 = vmatmul.mubr.bf16.gmra.mrb[4].mxu0 %v2186_v23  ;;  %860 = vmatmul.mubr.bf16.gmra.mrb[4].mxu1 %v2187_v24 }
  0x71   :  { %739 = vmatprep.mubr.bf16.mxu0 %v2188_v25  ;;  %867 = vmatprep.mubr.bf16.mxu1 %v2190_v26 }
  0x78   :  { %740 = vmatmul.mubr.bf16.gmra.mrb[8].mxu0 %v2192_v27  ;;  %868 = vmatmul.mubr.bf16.gmra.mrb[8].mxu1 %v2193_v28 }
  0x79   :  { %747 = vmatprep.mubr.bf16.mxu0 %v2194_v29  ;;  %875 = vmatprep.mubr.bf16.mxu1 %v2196_v30 }
  0x80   :  { %748 = vmatmul.mubr.bf16.gmra.mrb[12].mxu0 %v2198_v31  ;;  %876 = vmatmul.mubr.bf16.gmra.mrb[12].mxu1 %v2199_v32 }
  0x81   :  { %755 = vmatprep.mubr.bf16.mxu0 %v2200_v33  ;;  %883 = vmatprep.mubr.bf16.mxu1 %v2202_v34 }
  0x88   :  { %756 = vmatmul.mubr.bf16.gmra.mrb[16].mxu0 %v2204_v35  ;;  %884 = vmatmul.mubr.bf16.gmra.mrb[16].mxu1 %v2205_v36 }
  0x89   :  { %763 = vmatprep.mubr.bf16.mxu0 %v2206_v37  ;;  %891 = vmatprep.mubr.bf16.mxu1 %v2208_v38 }
  0x90   :  { %764 = vmatmul.mubr.bf16.gmra.mrb[20].mxu0 %v2210_v39  ;;  %892 = vmatmul.mubr.bf16.gmra.mrb[20].mxu1 %v2211_v40 }
  0x91   :  { %771 = vmatprep.mubr.bf16.mxu0 %v2212_v41  ;;  %899 = vmatprep.mubr.bf16.mxu1 %v2214_v42 }
  0x98   :  { %772 = vmatmul.mubr.bf16.gmra.mrb[24].mxu0 %v2216_v43  ;;  %900 = vmatmul.mubr.bf16.gmra.mrb[24].mxu1 %v2217_v44 }
  0x99   :  { %779 = vmatprep.mubr.bf16.mxu0 %v2218_v45  ;;  %907 = vmatprep.mubr.bf16.mxu1 %v2220_v46 }
  0xa0   :  { %780 = vmatmul.mubr.bf16.gmra.mrb[28].mxu0 %v2222_v47  ;;  %908 = vmatmul.mubr.bf16.gmra.mrb[28].mxu1 %v2223_v48 }
  0xa1   :  { %787 = vmatprep.mubr.bf16.mxu0 %v2224_v49  ;;  %915 = vmatprep.mubr.bf16.mxu1 %v2226_v50 }
  0xa8   :  { %788 = vmatmul.mubr.bf16.gmra.mrb[32].mxu0 %v2228_v51  ;;  %916 = vmatmul.mubr.bf16.gmra.mrb[32].mxu1 %v2229_v52 }
  0xa9   :  { %795 = vmatprep.mubr.bf16.mxu0 %v2230_v53  ;;  %923 = vmatprep.mubr.bf16.mxu1 %v2232_v54 }
  0xb0   :  { %796 = vmatmul.mubr.bf16.gmra.mrb[36].mxu0 %v2234_v55  ;;  %924 = vmatmul.mubr.bf16.gmra.mrb[36].mxu1 %v2235_v56 }
  0xb1   :  { %803 = vmatprep.mubr.bf16.mxu0 %v2236_v57  ;;  %931 = vmatprep.mubr.bf16.mxu1 %v2238_v58 }
  0xb8   :  { %804 = vmatmul.mubr.bf16.gmra.mrb[40].mxu0 %v2240_v59  ;;  %932 = vmatmul.mubr.bf16.gmra.mrb[40].mxu1 %v2241_v60 }
  0xb9   :  { %811 = vmatprep.mubr.bf16.mxu0 %v2242_v61  ;;  %939 = vmatprep.mubr.bf16.mxu1 %v2244_v62 }
  0xc0   :  { %812 = vmatmul.mubr.bf16.gmra.mrb[44].mxu0 %v2246_v63  ;;  %940 = vmatmul.mubr.bf16.gmra.mrb[44].mxu1 %v2247_v0 }
  0xc1   :  { %819 = vmatprep.mubr.bf16.mxu0 %v2248_v1  ;;  %947 = vmatprep.mubr.bf16.mxu1 %v2250_v2 }
  0xc8   :  { %820 = vmatmul.mubr.bf16.gmra.mrb[48].mxu0 %v2252_v3  ;;  %948 = vmatmul.mubr.bf16.gmra.mrb[48].mxu1 %v2253_v4 }
  0xc9   :  { %827 = vmatprep.mubr.bf16.mxu0 %v2254_v5  ;;  %955 = vmatprep.mubr.bf16.mxu1 %v2256_v6 }
  0xd0   :  { %828 = vmatmul.mubr.bf16.gmra.mrb[52].mxu0 %v2258_v7  ;;  %956 = vmatmul.mubr.bf16.gmra.mrb[52].mxu1 %v2259_v8 }
  0xd1   :  { %835 = vmatprep.mubr.bf16.mxu0 %v2260_v9  ;;  %963 = vmatprep.mubr.bf16.mxu1 %v2262_v10 }
  0xd8   :  { %836 = vmatmul.mubr.bf16.gmra.mrb[56].mxu0 %v2264_v11  ;;  %964 = vmatmul.mubr.bf16.gmra.mrb[56].mxu1 %v2265_v12 }
  0xd9   :  { %843 = vmatprep.mubr.bf16.mxu0 %v2266_v13  ;;  %971 = vmatprep.mubr.bf16.mxu1 %v2268_v14 }
  0xe0   :  { %844 = vmatmul.mubr.bf16.gmra.mrb[60].mxu0 %v2270_v15  ;;  %972 = vmatmul.mubr.bf16.gmra.mrb[60].mxu1 %v2271_v16 }
 0x13b   :  { %v725_v18 = vpop.f32.mrb[0].mxu0  ;;  %v853_v20 = vpop.f32.mrb[0].mxu1 }
 0x13c   :  { %v1182_v21 = vmul.f32 %v2439_v17, %v725_v18  ;;  %v1214_v22 = vmul.f32 %v2439_v17, %v853_v20  ;;  %v727_v23 = vpop.f32.mrb[1].mxu0  ;;  %v855_v24 = vpop.f32.mrb[1].mxu1 }
 0x13d   :  { %v728_v25 = vpop.f32.mrb[2].mxu0  ;;  %v856_v26 = vpop.f32.mrb[2].mxu1 }
 0x13e   :  { %v1253_v27 = vadd.f32 %v2444_v19, %v1182_v21  ;;  %v1285_v28 = vadd.f32 %v2444_v19, %v1214_v22  ;;  %v1183_v29 = vmul.f32 %v2439_v17, %v728_v25  ;;  %v1215_v30 = vmul.f32 %v2439_v17, %v856_v26  ;;  %v730_v31 = vpop.f32.mrb[3].mxu0  ;;  %v858_v32 = vpop.f32.mrb[3].mxu1 }
 0x140   :  { %v1254_v33 = vadd.f32 %v2444_v19, %v1183_v29  ;;  %v1286_v34 = vadd.f32 %v2444_v19, %v1215_v30  ;;  %v1317_v35 = vmax.f32 %v1253_v27, 0.0  ;;  %v1349_v36 = vmax.f32 %v1285_v28, 0.0 }
 0x142   :  { %v1318_v37 = vmax.f32 %v1254_v33, 0.0  ;;  %v1350_v38 = vmax.f32 %v1286_v34, 0.0 }
 0x143   :  { %v733_v39 = vpop.f32.mrb[4].mxu0  ;;  %v861_v40 = vpop.f32.mrb[4].mxu1 }
 0x144   :  { %v1932_v41 = vpack.c.bf16 %v1318_v37, %v1317_v35  ;;  %v2012_v42 = vpack.c.bf16 %v1350_v38, %v1349_v36  ;;  %v1184_v43 = vmul.f32 %v2439_v17, %v733_v39  ;;  %v1216_v44 = vmul.f32 %v2439_v17, %v861_v40  ;;  %v735_v45 = vpop.f32.mrb[5].mxu0  ;;  %v863_v46 = vpop.f32.mrb[5].mxu1 }
 0x145   :  { %v736_v47 = vpop.f32.mrb[6].mxu0  ;;  %v864_v48 = vpop.f32.mrb[6].mxu1 }
 0x146   :  { %1933 = vst [vmem:[#allocation8] sm:$0xff] %v1932_v41   ;;  %2104 = vst [vmem:[#allocation8 + $0x80] sm:$0xff] %v2012_v42   ;;  %v1255_v49 = vadd.f32 %v2444_v19, %v1184_v43  ;;  %v1287_v50 = vadd.f32 %v2444_v19, %v1216_v44  ;;  %v1185_v51 = vmul.f32 %v2439_v17, %v736_v47  ;;  %v738_v53 = vpop.f32.mrb[7].mxu0  ;;  %v866_v54 = vpop.f32.mrb[7].mxu1 }
 0x147   :  { %v1217_v52 = vmul.f32 %v2439_v17, %v864_v48 }
 0x148   :  { %v1256_v55 = vadd.f32 %v2444_v19, %v1185_v51  ;;  %v1319_v57 = vmax.f32 %v1255_v49, 0.0  ;;  %v1351_v58 = vmax.f32 %v1287_v50, 0.0 }
 0x149   :  { %v1288_v56 = vadd.f32 %v2444_v19, %v1217_v52 }
 0x14a   :  { %v1320_v59 = vmax.f32 %v1256_v55, 0.0 }
 0x14b   :  { %v1352_v60 = vmax.f32 %v1288_v56, 0.0  ;;  %v741_v61 = vpop.f32.mrb[8].mxu0  ;;  %v869_v62 = vpop.f32.mrb[8].mxu1 }
 0x14c   :  { %v1937_v63 = vpack.c.bf16 %v1320_v59, %v1319_v57  ;;  %v1186_v1 = vmul.f32 %v2439_v17, %v741_v61  ;;  %v1218_v2 = vmul.f32 %v2439_v17, %v869_v62  ;;  %v743_v3 = vpop.f32.mrb[9].mxu0  ;;  %v871_v4 = vpop.f32.mrb[9].mxu1 }
 0x14d   :  { %v2017_v0 = vpack.c.bf16 %v1352_v60, %v1351_v58  ;;  %v744_v5 = vpop.f32.mrb[10].mxu0  ;;  %v872_v6 = vpop.f32.mrb[10].mxu1 }
 0x14e   :  { %2089 = vst [vmem:[#allocation8 + $0x8] sm:$0xff] %v1937_v63   ;;  %v1257_v7 = vadd.f32 %v2444_v19, %v1186_v1  ;;  %v1289_v8 = vadd.f32 %v2444_v19, %v1218_v2  ;;  %v1187_v9 = vmul.f32 %v2439_v17, %v744_v5  ;;  %v1219_v10 = vmul.f32 %v2439_v17, %v872_v6  ;;  %v746_v11 = vpop.f32.mrb[11].mxu0  ;;  %v874_v12 = vpop.f32.mrb[11].mxu1 }
 0x14f   :  { %2105 = vst [vmem:[#allocation8 + $0x88] sm:$0xff] %v2017_v0  }
 0x150   :  { %v1258_v13 = vadd.f32 %v2444_v19, %v1187_v9  ;;  %v1290_v14 = vadd.f32 %v2444_v19, %v1219_v10  ;;  %v1321_v15 = vmax.f32 %v1257_v7, 0.0  ;;  %v1353_v16 = vmax.f32 %v1289_v8, 0.0 }
 0x152   :  { %v1322_v18 = vmax.f32 %v1258_v13, 0.0  ;;  %v1354_v20 = vmax.f32 %v1290_v14, 0.0 }
 0x153   :  { %v749_v21 = vpop.f32.mrb[12].mxu0  ;;  %v877_v22 = vpop.f32.mrb[12].mxu1 }
 0x154   :  { %v1942_v23 = vpack.c.bf16 %v1322_v18, %v1321_v15  ;;  %v2022_v24 = vpack.c.bf16 %v1354_v20, %v1353_v16  ;;  %v1188_v25 = vmul.f32 %v2439_v17, %v749_v21  ;;  %v1220_v26 = vmul.f32 %v2439_v17, %v877_v22  ;;  %v751_v27 = vpop.f32.mrb[13].mxu0  ;;  %v879_v28 = vpop.f32.mrb[13].mxu1 }
 0x155   :  { %v752_v29 = vpop.f32.mrb[14].mxu0  ;;  %v880_v30 = vpop.f32.mrb[14].mxu1 }
 0x156   :  { %2090 = vst [vmem:[#allocation8 + $0x10] sm:$0xff] %v1942_v23   ;;  %2106 = vst [vmem:[#allocation8 + $0x90] sm:$0xff] %v2022_v24   ;;  %v1259_v31 = vadd.f32 %v2444_v19, %v1188_v25  ;;  %v1291_v32 = vadd.f32 %v2444_v19, %v1220_v26  ;;  %v1189_v33 = vmul.f32 %v2439_v17, %v752_v29  ;;  %v754_v35 = vpop.f32.mrb[15].mxu0  ;;  %v882_v36 = vpop.f32.mrb[15].mxu1 }
 0x157   :  { %v1221_v34 = vmul.f32 %v2439_v17, %v880_v30 }
 0x158   :  { %v1260_v37 = vadd.f32 %v2444_v19, %v1189_v33  ;;  %v1323_v39 = vmax.f32 %v1259_v31, 0.0  ;;  %v1355_v40 = vmax.f32 %v1291_v32, 0.0 }
 0x159   :  { %v1292_v38 = vadd.f32 %v2444_v19, %v1221_v34 }
 0x15a   :  { %v1324_v41 = vmax.f32 %v1260_v37, 0.0 }
 0x15b   :  { %v1356_v42 = vmax.f32 %v1292_v38, 0.0  ;;  %v757_v43 = vpop.f32.mrb[16].mxu0  ;;  %v885_v44 = vpop.f32.mrb[16].mxu1 }
 0x15c   :  { %v1947_v45 = vpack.c.bf16 %v1324_v41, %v1323_v39  ;;  %v1190_v47 = vmul.f32 %v2439_v17, %v757_v43  ;;  %v1222_v48 = vmul.f32 %v2439_v17, %v885_v44  ;;  %v759_v49 = vpop.f32.mrb[17].mxu0  ;;  %v887_v50 = vpop.f32.mrb[17].mxu1 }
 0x15d   :  { %v2027_v46 = vpack.c.bf16 %v1356_v42, %v1355_v40  ;;  %v760_v51 = vpop.f32.mrb[18].mxu0  ;;  %v888_v52 = vpop.f32.mrb[18].mxu1 }
 0x15e   :  { %2091 = vst [vmem:[#allocation8 + $0x18] sm:$0xff] %v1947_v45   ;;  %v1261_v53 = vadd.f32 %v2444_v19, %v1190_v47  ;;  %v1293_v54 = vadd.f32 %v2444_v19, %v1222_v48  ;;  %v1191_v55 = vmul.f32 %v2439_v17, %v760_v51  ;;  %v1223_v56 = vmul.f32 %v2439_v17, %v888_v52  ;;  %v762_v57 = vpop.f32.mrb[19].mxu0  ;;  %v890_v58 = vpop.f32.mrb[19].mxu1 }
 0x15f   :  { %2107 = vst [vmem:[#allocation8 + $0x98] sm:$0xff] %v2027_v46  }
 0x160   :  { %v1262_v59 = vadd.f32 %v2444_v19, %v1191_v55  ;;  %v1294_v60 = vadd.f32 %v2444_v19, %v1223_v56  ;;  %v1325_v61 = vmax.f32 %v1261_v53, 0.0  ;;  %v1357_v62 = vmax.f32 %v1293_v54, 0.0 }
 0x162   :  { %v1326_v63 = vmax.f32 %v1262_v59, 0.0  ;;  %v1358_v0 = vmax.f32 %v1294_v60, 0.0 }
 0x163   :  { %v765_v1 = vpop.f32.mrb[20].mxu0  ;;  %v893_v2 = vpop.f32.mrb[20].mxu1 }
 0x164   :  { %v1952_v3 = vpack.c.bf16 %v1326_v63, %v1325_v61  ;;  %v2032_v4 = vpack.c.bf16 %v1358_v0, %v1357_v62  ;;  %v1192_v5 = vmul.f32 %v2439_v17, %v765_v1  ;;  %v1224_v6 = vmul.f32 %v2439_v17, %v893_v2  ;;  %v767_v7 = vpop.f32.mrb[21].mxu0  ;;  %v895_v8 = vpop.f32.mrb[21].mxu1 }
 0x165   :  { %v768_v9 = vpop.f32.mrb[22].mxu0  ;;  %v896_v10 = vpop.f32.mrb[22].mxu1 }
 0x166   :  { %2092 = vst [vmem:[#allocation8 + $0x20] sm:$0xff] %v1952_v3   ;;  %2108 = vst [vmem:[#allocation8 + $0xa0] sm:$0xff] %v2032_v4   ;;  %v1263_v11 = vadd.f32 %v2444_v19, %v1192_v5  ;;  %v1295_v12 = vadd.f32 %v2444_v19, %v1224_v6  ;;  %v1193_v13 = vmul.f32 %v2439_v17, %v768_v9  ;;  %v770_v15 = vpop.f32.mrb[23].mxu0  ;;  %v898_v16 = vpop.f32.mrb[23].mxu1 }
 0x167   :  { %v1225_v14 = vmul.f32 %v2439_v17, %v896_v10 }
 0x168   :  { %v1264_v18 = vadd.f32 %v2444_v19, %v1193_v13  ;;  %v1327_v21 = vmax.f32 %v1263_v11, 0.0  ;;  %v1359_v22 = vmax.f32 %v1295_v12, 0.0 }
 0x169   :  { %v1296_v20 = vadd.f32 %v2444_v19, %v1225_v14 }
 0x16a   :  { %v1328_v23 = vmax.f32 %v1264_v18, 0.0 }
 0x16b   :  { %v1360_v24 = vmax.f32 %v1296_v20, 0.0  ;;  %v773_v25 = vpop.f32.mrb[24].mxu0  ;;  %v901_v26 = vpop.f32.mrb[24].mxu1 }
 0x16c   :  { %v1957_v27 = vpack.c.bf16 %v1328_v23, %v1327_v21  ;;  %v1194_v29 = vmul.f32 %v2439_v17, %v773_v25  ;;  %v1226_v30 = vmul.f32 %v2439_v17, %v901_v26  ;;  %v775_v31 = vpop.f32.mrb[25].mxu0  ;;  %v903_v32 = vpop.f32.mrb[25].mxu1 }
 0x16d   :  { %v2037_v28 = vpack.c.bf16 %v1360_v24, %v1359_v22  ;;  %v776_v33 = vpop.f32.mrb[26].mxu0  ;;  %v904_v34 = vpop.f32.mrb[26].mxu1 }
 0x16e   :  { %2093 = vst [vmem:[#allocation8 + $0x28] sm:$0xff] %v1957_v27   ;;  %v1265_v35 = vadd.f32 %v2444_v19, %v1194_v29  ;;  %v1297_v36 = vadd.f32 %v2444_v19, %v1226_v30  ;;  %v1195_v37 = vmul.f32 %v2439_v17, %v776_v33  ;;  %v1227_v38 = vmul.f32 %v2439_v17, %v904_v34  ;;  %v778_v39 = vpop.f32.mrb[27].mxu0  ;;  %v906_v40 = vpop.f32.mrb[27].mxu1 }
 0x16f   :  { %2109 = vst [vmem:[#allocation8 + $0xa8] sm:$0xff] %v2037_v28  }
 0x170   :  { %v1266_v41 = vadd.f32 %v2444_v19, %v1195_v37  ;;  %v1298_v42 = vadd.f32 %v2444_v19, %v1227_v38  ;;  %v1329_v43 = vmax.f32 %v1265_v35, 0.0  ;;  %v1361_v44 = vmax.f32 %v1297_v36, 0.0 }
 0x172   :  { %v1330_v45 = vmax.f32 %v1266_v41, 0.0  ;;  %v1362_v46 = vmax.f32 %v1298_v42, 0.0 }
 0x173   :  { %v781_v47 = vpop.f32.mrb[28].mxu0  ;;  %v909_v48 = vpop.f32.mrb[28].mxu1 }
 0x174   :  { %v1962_v49 = vpack.c.bf16 %v1330_v45, %v1329_v43  ;;  %v2042_v50 = vpack.c.bf16 %v1362_v46, %v1361_v44  ;;  %v1196_v51 = vmul.f32 %v2439_v17, %v781_v47  ;;  %v1228_v52 = vmul.f32 %v2439_v17, %v909_v48  ;;  %v783_v53 = vpop.f32.mrb[29].mxu0  ;;  %v911_v54 = vpop.f32.mrb[29].mxu1 }
 0x175   :  { %v784_v55 = vpop.f32.mrb[30].mxu0  ;;  %v912_v56 = vpop.f32.mrb[30].mxu1 }
 0x176   :  { %2094 = vst [vmem:[#allocation8 + $0x30] sm:$0xff] %v1962_v49   ;;  %2110 = vst [vmem:[#allocation8 + $0xb0] sm:$0xff] %v2042_v50   ;;  %v1267_v57 = vadd.f32 %v2444_v19, %v1196_v51  ;;  %v1299_v58 = vadd.f32 %v2444_v19, %v1228_v52  ;;  %v1197_v59 = vmul.f32 %v2439_v17, %v784_v55  ;;  %v786_v61 = vpop.f32.mrb[31].mxu0  ;;  %v914_v62 = vpop.f32.mrb[31].mxu1 }
 0x177   :  { %v1229_v60 = vmul.f32 %v2439_v17, %v912_v56 }
 0x178   :  { %v1268_v63 = vadd.f32 %v2444_v19, %v1197_v59  ;;  %v1331_v1 = vmax.f32 %v1267_v57, 0.0  ;;  %v1363_v2 = vmax.f32 %v1299_v58, 0.0 }
 0x179   :  { %v1300_v0 = vadd.f32 %v2444_v19, %v1229_v60 }
 0x17a   :  { %v1332_v3 = vmax.f32 %v1268_v63, 0.0 }
 0x17b   :  { %v1364_v4 = vmax.f32 %v1300_v0, 0.0  ;;  %v789_v5 = vpop.f32.mrb[32].mxu0  ;;  %v917_v6 = vpop.f32.mrb[32].mxu1 }
 0x17c   :  { %v1967_v7 = vpack.c.bf16 %v1332_v3, %v1331_v1  ;;  %v1198_v9 = vmul.f32 %v2439_v17, %v789_v5  ;;  %v1230_v10 = vmul.f32 %v2439_v17, %v917_v6  ;;  %v791_v11 = vpop.f32.mrb[33].mxu0  ;;  %v919_v12 = vpop.f32.mrb[33].mxu1 }
 0x17d   :  { %v2047_v8 = vpack.c.bf16 %v1364_v4, %v1363_v2  ;;  %v792_v13 = vpop.f32.mrb[34].mxu0  ;;  %v920_v14 = vpop.f32.mrb[34].mxu1 }
 0x17e   :  { %2095 = vst [vmem:[#allocation8 + $0x38] sm:$0xff] %v1967_v7   ;;  %v1269_v15 = vadd.f32 %v2444_v19, %v1198_v9  ;;  %v1301_v16 = vadd.f32 %v2444_v19, %v1230_v10  ;;  %v1199_v18 = vmul.f32 %v2439_v17, %v792_v13  ;;  %v1231_v20 = vmul.f32 %v2439_v17, %v920_v14  ;;  %v794_v21 = vpop.f32.mrb[35].mxu0  ;;  %v922_v22 = vpop.f32.mrb[35].mxu1 }
 0x17f   :  { %2111 = vst [vmem:[#allocation8 + $0xb8] sm:$0xff] %v2047_v8  }
 0x180   :  { %v1270_v23 = vadd.f32 %v2444_v19, %v1199_v18  ;;  %v1302_v24 = vadd.f32 %v2444_v19, %v1231_v20  ;;  %v1333_v25 = vmax.f32 %v1269_v15, 0.0  ;;  %v1365_v26 = vmax.f32 %v1301_v16, 0.0 }
 0x182   :  { %v1334_v27 = vmax.f32 %v1270_v23, 0.0  ;;  %v1366_v28 = vmax.f32 %v1302_v24, 0.0 }
 0x183   :  { %v797_v29 = vpop.f32.mrb[36].mxu0  ;;  %v925_v30 = vpop.f32.mrb[36].mxu1 }
 0x184   :  { %v1972_v31 = vpack.c.bf16 %v1334_v27, %v1333_v25  ;;  %v2052_v32 = vpack.c.bf16 %v1366_v28, %v1365_v26  ;;  %v1200_v33 = vmul.f32 %v2439_v17, %v797_v29  ;;  %v1232_v34 = vmul.f32 %v2439_v17, %v925_v30  ;;  %v799_v35 = vpop.f32.mrb[37].mxu0  ;;  %v927_v36 = vpop.f32.mrb[37].mxu1 }
 0x185   :  { %v800_v37 = vpop.f32.mrb[38].mxu0  ;;  %v928_v38 = vpop.f32.mrb[38].mxu1 }
 0x186   :  { %2096 = vst [vmem:[#allocation8 + $0x40] sm:$0xff] %v1972_v31   ;;  %2112 = vst [vmem:[#allocation8 + $0xc0] sm:$0xff] %v2052_v32   ;;  %v1271_v39 = vadd.f32 %v2444_v19, %v1200_v33  ;;  %v1303_v40 = vadd.f32 %v2444_v19, %v1232_v34  ;;  %v1201_v41 = vmul.f32 %v2439_v17, %v800_v37  ;;  %v802_v43 = vpop.f32.mrb[39].mxu0  ;;  %v930_v44 = vpop.f32.mrb[39].mxu1 }
 0x187   :  { %v1233_v42 = vmul.f32 %v2439_v17, %v928_v38 }
 0x188   :  { %v1272_v45 = vadd.f32 %v2444_v19, %v1201_v41  ;;  %v1335_v47 = vmax.f32 %v1271_v39, 0.0  ;;  %v1367_v48 = vmax.f32 %v1303_v40, 0.0 }
 0x189   :  { %v1304_v46 = vadd.f32 %v2444_v19, %v1233_v42 }
 0x18a   :  { %v1336_v49 = vmax.f32 %v1272_v45, 0.0 }
 0x18b   :  { %v1368_v50 = vmax.f32 %v1304_v46, 0.0  ;;  %v805_v51 = vpop.f32.mrb[40].mxu0  ;;  %v933_v52 = vpop.f32.mrb[40].mxu1 }
 0x18c   :  { %v1977_v53 = vpack.c.bf16 %v1336_v49, %v1335_v47  ;;  %v1202_v55 = vmul.f32 %v2439_v17, %v805_v51  ;;  %v1234_v56 = vmul.f32 %v2439_v17, %v933_v52  ;;  %v807_v57 = vpop.f32.mrb[41].mxu0  ;;  %v935_v58 = vpop.f32.mrb[41].mxu1 }
 0x18d   :  { %v2057_v54 = vpack.c.bf16 %v1368_v50, %v1367_v48  ;;  %v808_v59 = vpop.f32.mrb[42].mxu0  ;;  %v936_v60 = vpop.f32.mrb[42].mxu1 }
 0x18e   :  { %2097 = vst [vmem:[#allocation8 + $0x48] sm:$0xff] %v1977_v53   ;;  %v1273_v61 = vadd.f32 %v2444_v19, %v1202_v55  ;;  %v1305_v62 = vadd.f32 %v2444_v19, %v1234_v56  ;;  %v1203_v63 = vmul.f32 %v2439_v17, %v808_v59  ;;  %v1235_v0 = vmul.f32 %v2439_v17, %v936_v60  ;;  %v810_v1 = vpop.f32.mrb[43].mxu0  ;;  %v938_v2 = vpop.f32.mrb[43].mxu1 }
 0x18f   :  { %2113 = vst [vmem:[#allocation8 + $0xc8] sm:$0xff] %v2057_v54  }
 0x190   :  { %v1274_v3 = vadd.f32 %v2444_v19, %v1203_v63  ;;  %v1306_v4 = vadd.f32 %v2444_v19, %v1235_v0  ;;  %v1337_v5 = vmax.f32 %v1273_v61, 0.0  ;;  %v1369_v6 = vmax.f32 %v1305_v62, 0.0 }
 0x192   :  { %v1338_v7 = vmax.f32 %v1274_v3, 0.0  ;;  %v1370_v8 = vmax.f32 %v1306_v4, 0.0 }
 0x193   :  { %v813_v9 = vpop.f32.mrb[44].mxu0  ;;  %v941_v10 = vpop.f32.mrb[44].mxu1 }
 0x194   :  { %v1982_v11 = vpack.c.bf16 %v1338_v7, %v1337_v5  ;;  %v2062_v12 = vpack.c.bf16 %v1370_v8, %v1369_v6  ;;  %v1204_v13 = vmul.f32 %v2439_v17, %v813_v9  ;;  %v1236_v14 = vmul.f32 %v2439_v17, %v941_v10  ;;  %v815_v15 = vpop.f32.mrb[45].mxu0  ;;  %v943_v16 = vpop.f32.mrb[45].mxu1 }
 0x195   :  { %v816_v18 = vpop.f32.mrb[46].mxu0  ;;  %v944_v20 = vpop.f32.mrb[46].mxu1 }
 0x196   :  { %2098 = vst [vmem:[#allocation8 + $0x50] sm:$0xff] %v1982_v11   ;;  %2114 = vst [vmem:[#allocation8 + $0xd0] sm:$0xff] %v2062_v12   ;;  %v1275_v21 = vadd.f32 %v2444_v19, %v1204_v13  ;;  %v1307_v22 = vadd.f32 %v2444_v19, %v1236_v14  ;;  %v1205_v23 = vmul.f32 %v2439_v17, %v816_v18  ;;  %v818_v25 = vpop.f32.mrb[47].mxu0  ;;  %v946_v26 = vpop.f32.mrb[47].mxu1 }
 0x197   :  { %v1237_v24 = vmul.f32 %v2439_v17, %v944_v20 }
 0x198   :  { %v1276_v27 = vadd.f32 %v2444_v19, %v1205_v23  ;;  %v1339_v29 = vmax.f32 %v1275_v21, 0.0  ;;  %v1371_v30 = vmax.f32 %v1307_v22, 0.0 }
 0x199   :  { %v1308_v28 = vadd.f32 %v2444_v19, %v1237_v24 }
 0x19a   :  { %v1340_v31 = vmax.f32 %v1276_v27, 0.0 }
 0x19b   :  { %v1372_v32 = vmax.f32 %v1308_v28, 0.0  ;;  %v821_v33 = vpop.f32.mrb[48].mxu0  ;;  %v949_v34 = vpop.f32.mrb[48].mxu1 }
 0x19c   :  { %v1987_v35 = vpack.c.bf16 %v1340_v31, %v1339_v29  ;;  %v1206_v37 = vmul.f32 %v2439_v17, %v821_v33  ;;  %v1238_v38 = vmul.f32 %v2439_v17, %v949_v34  ;;  %v823_v39 = vpop.f32.mrb[49].mxu0  ;;  %v951_v40 = vpop.f32.mrb[49].mxu1 }
 0x19d   :  { %v2067_v36 = vpack.c.bf16 %v1372_v32, %v1371_v30  ;;  %v824_v41 = vpop.f32.mrb[50].mxu0  ;;  %v952_v42 = vpop.f32.mrb[50].mxu1 }
 0x19e   :  { %2099 = vst [vmem:[#allocation8 + $0x58] sm:$0xff] %v1987_v35   ;;  %v1277_v43 = vadd.f32 %v2444_v19, %v1206_v37  ;;  %v1309_v44 = vadd.f32 %v2444_v19, %v1238_v38  ;;  %v1207_v45 = vmul.f32 %v2439_v17, %v824_v41  ;;  %v1239_v46 = vmul.f32 %v2439_v17, %v952_v42  ;;  %v826_v47 = vpop.f32.mrb[51].mxu0  ;;  %v954_v48 = vpop.f32.mrb[51].mxu1 }
 0x19f   :  { %2115 = vst [vmem:[#allocation8 + $0xd8] sm:$0xff] %v2067_v36  }
 0x1a0   :  { %v1278_v49 = vadd.f32 %v2444_v19, %v1207_v45  ;;  %v1310_v50 = vadd.f32 %v2444_v19, %v1239_v46  ;;  %v1341_v51 = vmax.f32 %v1277_v43, 0.0  ;;  %v1373_v52 = vmax.f32 %v1309_v44, 0.0 }
 0x1a2   :  { %v1342_v53 = vmax.f32 %v1278_v49, 0.0  ;;  %v1374_v54 = vmax.f32 %v1310_v50, 0.0 }
 0x1a3   :  { %v829_v55 = vpop.f32.mrb[52].mxu0  ;;  %v957_v56 = vpop.f32.mrb[52].mxu1 }
 0x1a4   :  { %v1992_v57 = vpack.c.bf16 %v1342_v53, %v1341_v51  ;;  %v2072_v58 = vpack.c.bf16 %v1374_v54, %v1373_v52  ;;  %v1208_v59 = vmul.f32 %v2439_v17, %v829_v55  ;;  %v1240_v60 = vmul.f32 %v2439_v17, %v957_v56  ;;  %v831_v61 = vpop.f32.mrb[53].mxu0  ;;  %v959_v62 = vpop.f32.mrb[53].mxu1 }
 0x1a5   :  { %v832_v63 = vpop.f32.mrb[54].mxu0  ;;  %v960_v0 = vpop.f32.mrb[54].mxu1 }
 0x1a6   :  { %2100 = vst [vmem:[#allocation8 + $0x60] sm:$0xff] %v1992_v57   ;;  %2116 = vst [vmem:[#allocation8 + $0xe0] sm:$0xff] %v2072_v58   ;;  %v1279_v1 = vadd.f32 %v2444_v19, %v1208_v59  ;;  %v1311_v2 = vadd.f32 %v2444_v19, %v1240_v60  ;;  %v1209_v3 = vmul.f32 %v2439_v17, %v832_v63  ;;  %v834_v5 = vpop.f32.mrb[55].mxu0  ;;  %v962_v6 = vpop.f32.mrb[55].mxu1 }
 0x1a7   :  { %v1241_v4 = vmul.f32 %v2439_v17, %v960_v0 }
 0x1a8   :  { %v1280_v7 = vadd.f32 %v2444_v19, %v1209_v3  ;;  %v1343_v9 = vmax.f32 %v1279_v1, 0.0  ;;  %v1375_v10 = vmax.f32 %v1311_v2, 0.0 }
 0x1a9   :  { %v1312_v8 = vadd.f32 %v2444_v19, %v1241_v4 }
 0x1aa   :  { %v1344_v11 = vmax.f32 %v1280_v7, 0.0 }
 0x1ab   :  { %v1376_v12 = vmax.f32 %v1312_v8, 0.0  ;;  %v837_v13 = vpop.f32.mrb[56].mxu0  ;;  %v965_v14 = vpop.f32.mrb[56].mxu1 }
 0x1ac   :  { %v1997_v15 = vpack.c.bf16 %v1344_v11, %v1343_v9  ;;  %v1210_v18 = vmul.f32 %v2439_v17, %v837_v13  ;;  %v1242_v20 = vmul.f32 %v2439_v17, %v965_v14  ;;  %v839_v21 = vpop.f32.mrb[57].mxu0  ;;  %v967_v22 = vpop.f32.mrb[57].mxu1 }
 0x1ad   :  { %v2077_v16 = vpack.c.bf16 %v1376_v12, %v1375_v10  ;;  %v840_v23 = vpop.f32.mrb[58].mxu0  ;;  %v968_v24 = vpop.f32.mrb[58].mxu1 }
 0x1ae   :  { %2101 = vst [vmem:[#allocation8 + $0x68] sm:$0xff] %v1997_v15   ;;  %v1281_v25 = vadd.f32 %v2444_v19, %v1210_v18  ;;  %v1313_v26 = vadd.f32 %v2444_v19, %v1242_v20  ;;  %v1211_v27 = vmul.f32 %v2439_v17, %v840_v23  ;;  %v1243_v28 = vmul.f32 %v2439_v17, %v968_v24  ;;  %v842_v29 = vpop.f32.mrb[59].mxu0  ;;  %v970_v30 = vpop.f32.mrb[59].mxu1 }
 0x1af   :  { %2117 = vst [vmem:[#allocation8 + $0xe8] sm:$0xff] %v2077_v16  }
 0x1b0   :  { %v1282_v31 = vadd.f32 %v2444_v19, %v1211_v27  ;;  %v1314_v32 = vadd.f32 %v2444_v19, %v1243_v28  ;;  %v1345_v33 = vmax.f32 %v1281_v25, 0.0  ;;  %v1377_v34 = vmax.f32 %v1313_v26, 0.0 }
 0x1b2   :  { %v1346_v35 = vmax.f32 %v1282_v31, 0.0  ;;  %v1378_v36 = vmax.f32 %v1314_v32, 0.0 }
 0x1b3   :  { %v845_v37 = vpop.f32.mrb[60].mxu0  ;;  %v973_v38 = vpop.f32.mrb[60].mxu1 }
 0x1b4   :  { %v2002_v39 = vpack.c.bf16 %v1346_v35, %v1345_v33  ;;  %v2082_v40 = vpack.c.bf16 %v1378_v36, %v1377_v34  ;;  %v1212_v41 = vmul.f32 %v2439_v17, %v845_v37  ;;  %v1244_v42 = vmul.f32 %v2439_v17, %v973_v38  ;;  %v847_v43 = vpop.f32.mrb[61].mxu0  ;;  %v975_v44 = vpop.f32.mrb[61].mxu1 }
 0x1b5   :  { %v848_v45 = vpop.f32.mrb[62].mxu0  ;;  %v976_v46 = vpop.f32.mrb[62].mxu1 }
 0x1b6   :  { %2102 = vst [vmem:[#allocation8 + $0x70] sm:$0xff] %v2002_v39   ;;  %2118 = vst [vmem:[#allocation8 + $0xf0] sm:$0xff] %v2082_v40   ;;  %v1283_v47 = vadd.f32 %v2444_v19, %v1212_v41  ;;  %v1315_v48 = vadd.f32 %v2444_v19, %v1244_v42  ;;  %v1213_v49 = vmul.f32 %v2439_v17, %v848_v45  ;;  %v850_v51 = vpop.f32.mrb[63].mxu0  ;;  %v978_v52 = vpop.f32.mrb[63].mxu1 }
 0x1b7   :  { %v1245_v50 = vmul.f32 %v2439_v17, %v976_v46 }
 0x1b8   :  { %v1284_v53 = vadd.f32 %v2444_v19, %v1213_v49  ;;  %v1347_v55 = vmax.f32 %v1283_v47, 0.0  ;;  %v1379_v56 = vmax.f32 %v1315_v48, 0.0 }
 0x1b9   :  { %v1316_v54 = vadd.f32 %v2444_v19, %v1245_v50 }
 0x1ba   :  { %v1348_v57 = vmax.f32 %v1284_v53, 0.0 }
 0x1bb   :  { %v1380_v58 = vmax.f32 %v1316_v54, 0.0 }
 0x1bc   :  { %v2007_v59 = vpack.c.bf16 %v1348_v57, %v1347_v55 }
 0x1bd   :  { %v2087_v60 = vpack.c.bf16 %v1380_v58, %v1379_v56 }
 0x1be   :  { %2103 = vst [vmem:[#allocation8 + $0x78] sm:$0xff] %v2007_v59  }
 0x1bf   :  { %2119 = vst [vmem:[#allocation8 + $0xf8] sm:$0xff] %v2087_v60  }
 0x1c0   :  { %2327 = shalt.err (!%p2324_p6)
}
 0x1c1   :  { %s2328_s22 = scalar_lea.hbm %s2593_s4, 4096 }
 0x1c2   :  { %p2329_p7 = scmp.ne.s32.totalorder %s2593_s4, %s2328_s22  ;;  %p2332_p8 = scmp.lt.u32.totalorder %s2328_s22, %s2593_s4 }
 0x1c4   :  { %p2334_p9 = pnand %p2332_p8, %p2329_p7 }
 0x1c6   :  { %2337 = shalt.err (!%p2334_p9)
}
 0x1c7   :  { %1712 = dma.vmem_to_hbm [thread:$0]  %s1707_s3, 4096, %s2593_s4, [#allocation5], %s2348_s0, %s2348_s0, %s2349_s13  }
 0x1c8   :  { %2342 = dma.done.wait [#allocation5], 4096  }
 0x1c9   :  { %2343 = vsyncadd [#allocation5], 4294963200 }
 0x1ca   :  { %1716 = vsyncpa [#allocation4], 1 }
 0x1cb   :  { %1717 = vsyncpa [#allocation7], 1 }
 0x1cc   :  { %1718 = vsyncpa [#allocation5], 1 }

</bundles_post_ra>
